<compile_context>
chip_gen: v7x
topology: tpu7x:2x2x1
jax: 0.10.0
libtpu: 0.0.40
codegen_flags: <defaults>
</compile_context>

<pallas_src>
import jax
import jax.numpy as jnp
from jax import lax
from jax.experimental import pallas as pl
from jax.experimental.pallas import tpu as pltpu


# --------------------------------------------------------------------------- #
# phase 1: node -> hyperedge aggregation (reduction over node tiles)
# --------------------------------------------------------------------------- #
def _edge_agg_kernel(x_ref, h_ref, theta_ref, e_ref, e_acc, b_acc):
    step = pl.program_id(0)

    @pl.when(step == 0)
    def _init():
        e_acc[...] = jnp.zeros_like(e_acc)
        b_acc[...] = jnp.zeros_like(b_acc)

    h = h_ref[...]                                      # (tile_N, M)  bf16 0/1
    x = x_ref[...].astype(jnp.bfloat16)                 # (tile_N, F_in)
    theta = theta_ref[...]                              # (F_in, F_hid) bf16

    # X @ Theta  (bf16 inputs, f32 accumulation on the MXU)
    xw = jnp.dot(x, theta, preferred_element_type=jnp.float32)          # (tile_N, F_hid)

    # Unnormalized node->edge aggregation: contract over the node (row) axis.
    # The 1/B scaling is applied AFTER this matmul (see finalize), on the (M, F_hid)
    # result rather than on the (N, M) operand, removing an N*M VPU multiply.
    e_acc[...] += lax.dot_general(
        h, xw.astype(jnp.bfloat16),
        dimension_numbers=(((0,), (0,)), ((), ())),
        preferred_element_type=jnp.float32)                             # (M, F_hid)

    # Hyperedge degrees B_e, accumulated directly as an (M, 1) column via a tiny
    # matmul (avoids a lane->sublane relayout of a (1, M) row of column sums).
    ones_col = jnp.ones((h.shape[0], 1), dtype=h.dtype)
    b_acc[...] += lax.dot_general(
        h, ones_col,
        dimension_numbers=(((0,), (0,)), ((), ())),
        preferred_element_type=jnp.float32)                             # (M, 1)

    @pl.when(step == pl.num_programs(0) - 1)
    def _finalize():
        b = b_acc[...]
        b_inv = jnp.where(b > 0.0, pl.reciprocal(b, approx=True), 0.0)  # EUP
        e_ref[...] = (b_inv * e_acc[...]).astype(e_ref.dtype)


# --------------------------------------------------------------------------- #
# phase 2: hyperedge -> node aggregation + bias + ReLU + output Linear
# --------------------------------------------------------------------------- #
def _node_update_kernel(h_ref, e_ref, bias_ref, wout_ref, bout_ref, z_ref):
    h = h_ref[...]                                      # (tile_N, M)   bf16 0/1
    e_feat = e_ref[...]                                 # (M, F_hid)    bf16

    # hyperedge -> node aggregation (MXU, f32 accumulate)
    agg = jnp.dot(h, e_feat, preferred_element_type=jnp.float32)        # (tile_N, F_hid)

    # node degrees D_v folded into this phase: the H tile is already resident in VMEM
    d = jnp.sum(h.astype(jnp.float32), axis=1, keepdims=True)           # (tile_N, 1)
    d_inv = jnp.where(d > 0.0, pl.reciprocal(d, approx=True), 0.0)      # EUP

    out = d_inv * agg + bias_ref[...]                   # f32 elementwise (+ conv bias)
    emb = jnp.maximum(out, 0.0)                         # ReLU

    # output Linear, lane-padded to a multiple of 128 classes (dense, unmasked stores)
    z = jnp.dot(emb.astype(jnp.bfloat16), wout_ref[...],
                preferred_element_type=jnp.float32) + bout_ref[...]
    z_ref[...] = z


# --------------------------------------------------------------------------- #
# wrapper
# --------------------------------------------------------------------------- #
def _vmem_capacity_bytes():
    try:
        return int(pltpu.get_tpu_info().vmem_capacity_bytes)
    except Exception:
        return 64 * 1024 * 1024     # conservative (v7x-sized) fallback


def _pick_tile_rows(n_nodes, m_edges, f_in, c_pad):
    """Generation-aware node tile: v7x (64 MiB VMEM) gets ~half the v5e/v6e tile."""
    budget = int(_vmem_capacity_bytes() * 0.35)          # leave room for scratch/params
    # double-buffered per-row bytes, worst case over the two phases
    per_row = 2 * (m_edges * 2 + max(f_in, c_pad) * 4)
    tile = budget // max(per_row, 1)
    tile = max(8, min(n_nodes, tile))
    if tile < n_nodes:
        tile -= tile % 8
    # keep the phase-1 reduction exact: the tile must evenly divide the node count
    while tile > 8 and n_nodes % tile != 0:
        tile -= 8
    if tile <= 0 or n_nodes % tile != 0:
        tile = n_nodes
    return tile


def gnn_forward(x, H, theta, bias, w_out, b_out, *, tile_rows=None):
    """Forward pass of GNN: HypergraphConv(64->32, no attention) + ReLU + Linear(32->C)."""
    n_nodes, f_in = x.shape
    m_edges = H.shape[1]
    f_hid, n_cls = w_out.shape
    c_pad = 128 * pl.cdiv(n_cls, 128)

    # bf16 matmul operands (H is 0/1 -> exact in bf16); accumulation stays in f32.
    h_bf16 = H.astype(jnp.bfloat16)
    theta_bf16 = theta.astype(jnp.bfloat16)
    w_out_p = (jnp.zeros((f_hid, c_pad), jnp.float32)
               .at[:, :n_cls].set(w_out.astype(jnp.float32))
               .astype(jnp.bfloat16))
    b_out_p = (jnp.zeros((1, c_pad), jnp.float32)
               .at[:, :n_cls].set(b_out.astype(jnp.float32)))
    bias2d = bias.reshape(1, f_hid).astype(jnp.float32)

    if tile_rows is None:
        tile_rows = _pick_tile_rows(n_nodes, m_edges, f_in, c_pad)
    assert n_nodes % tile_rows == 0, (n_nodes, tile_rows)
    grid = (n_nodes // tile_rows,)

    vmem_limit = min(int(_vmem_capacity_bytes() * 0.6), 96 * 1024 * 1024)

    # ---- phase 1: node -> hyperedge aggregation (reduction over node tiles) ----
    e_feat = pl.pallas_call(
        _edge_agg_kernel,
        out_shape=jax.ShapeDtypeStruct((m_edges, f_hid), jnp.bfloat16),
        grid_spec=pltpu.PrefetchScalarGridSpec(
            num_scalar_prefetch=0,
            grid=grid,
            in_specs=[
                pl.BlockSpec((tile_rows, f_in), lambda i: (i, 0)),      # x tile
                pl.BlockSpec((tile_rows, m_edges), lambda i: (i, 0)),   # H tile
                pl.BlockSpec((f_in, f_hid), lambda i: (0, 0)),          # Theta (resident)
            ],
            out_specs=pl.BlockSpec((m_edges, f_hid), lambda i: (0, 0)),
            scratch_shapes=[
                pltpu.VMEM((m_edges, f_hid), jnp.float32),   # e_sum accumulator
                pltpu.VMEM((m_edges, 1), jnp.float32),       # hyperedge degrees B
            ],
        ),
        compiler_params=pltpu.CompilerParams(
            dimension_semantics=("arbitrary",),              # reduction over node tiles
            vmem_limit_bytes=vmem_limit,
        ),
    )(x, h_bf16, theta_bf16)

    # ---- phase 2: hyperedge -> node aggregation + ReLU + output Linear ---------
    # NOTE: H is read again here with the same tiled BlockSpec so both passes
    # double-buffer; when N*M*2B fits resident the two phases could be fused.
    z_pad = pl.pallas_call(
        _node_update_kernel,
        out_shape=jax.ShapeDtypeStruct((n_nodes, c_pad), jnp.float32),
        grid_spec=pltpu.PrefetchScalarGridSpec(
            num_scalar_prefetch=0,
            grid=grid,
            in_specs=[
                pl.BlockSpec((tile_rows, m_edges), lambda i: (i, 0)),   # H tile
                pl.BlockSpec((m_edges, f_hid), lambda i: (0, 0)),       # E (resident)
                pl.BlockSpec((1, f_hid), lambda i: (0, 0)),             # conv bias
                pl.BlockSpec((f_hid, c_pad), lambda i: (0, 0)),         # W_out (padded)
                pl.BlockSpec((1, c_pad), lambda i: (0, 0)),             # b_out (padded)
            ],
            out_specs=pl.BlockSpec((tile_rows, c_pad), lambda i: (i, 0)),
        ),
        compiler_params=pltpu.CompilerParams(
            dimension_semantics=("parallel",),   # shard node tiles across TCs (v7x)
            vmem_limit_bytes=vmem_limit,
        ),
    )(h_bf16, e_feat, bias2d, w_out_p, b_out_p)

    return z_pad[:, :n_cls]


# --------------------------------------------------------------------------- #
# glue + reference
# --------------------------------------------------------------------------- #
def build_incidence(edge_index, num_nodes, num_hyperedges):
    # scatter sparse (node, hyperedge) pairs into a dense 0/1 incidence matrix
    H = jnp.zeros((num_nodes, num_hyperedges), jnp.float32)
    H = H.at[edge_index[0], edge_index[1]].add(1.0)
    return jnp.minimum(H, 1.0)


def gnn_reference(x, H, theta, bias, w_out, b_out):
    # pure-JAX f32 reference
    xw = x @ theta
    B = H.sum(0)
    B_inv = jnp.where(B > 0, 1.0 / B, 0.0)
    D = H.sum(1)
    D_inv = jnp.where(D > 0, 1.0 / D, 0.0)
    e = (H * B_inv[None, :]).T @ xw
    o = D_inv[:, None] * (H @ e) + bias
    return jnp.maximum(o, 0.0) @ w_out + b_out


if __name__ == "__main__":
    key = jax.random.PRNGKey(0)
    N, M, F_IN, F_HID, NUM_CLASSES = 16, 8, 64, 32, 4

    k_x, k_n, k_th, k_b, k_wo, k_bo = jax.random.split(key, 6)

    # node features and hyperedge index (2, E): row0 = node ids, row1 = hyperedge ids
    x = jax.random.normal(k_x, (N, F_IN), jnp.float32)
    edge_nodes = jax.random.randint(k_n, (M * 4,), 0, N)
    edge_ids = jnp.repeat(jnp.arange(M, dtype=jnp.int32), 4)
    edge_index = jnp.stack([edge_nodes.astype(jnp.int32), edge_ids])   # (2, 32)
    print(edge_index.shape[0])  # mirrors `print(len(edge_index))` in the module

    # deterministic parameters (HypergraphConv: Theta + bias; out Linear: W + b)
    theta = jax.random.normal(k_th, (F_IN, F_HID), jnp.float32) * (1.0 / jnp.sqrt(F_IN))
    bias = jax.random.normal(k_b, (1, F_HID), jnp.float32) * 0.01
    w_out = jax.random.normal(k_wo, (F_HID, NUM_CLASSES), jnp.float32) * (1.0 / jnp.sqrt(F_HID))
    b_out = jax.random.normal(k_bo, (1, NUM_CLASSES), jnp.float32) * 0.01

    H = build_incidence(edge_index, N, M)

    # tile_rows=8 so the small test still exercises a multi-step grid
    # (phase-1 accumulator init/finalize + phase-2 parallel node tiles).
    z = gnn_forward(x, H, theta, bias, w_out, b_out, tile_rows=8)
    jax.block_until_ready(z)

    z_ref = gnn_reference(x, H, theta, bias, w_out, b_out)
    assert z.shape == (N, NUM_CLASSES)
    # bf16 matmul inputs + EUP approx reciprocals vs. the pure-f32 reference
    assert jnp.allclose(z, z_ref, atol=5e-2, rtol=5e-2), float(jnp.max(jnp.abs(z - z_ref)))

    print("KERNEL_OK")
</pallas_src>

<mosaic_0001>
module attributes {stable_mosaic.version = 11 : i64} {
  func.func @_edge_agg_kernel(%arg0: i32, %arg1: memref<8x64xf32, #tpu.memory_space<vmem>>, %arg2: memref<8x8xbf16, #tpu.memory_space<vmem>>, %arg3: memref<64x32xbf16, #tpu.memory_space<vmem>>, %arg4: memref<8x32xbf16, #tpu.memory_space<vmem>>, %arg5: memref<8x32xf32, #tpu.memory_space<vmem>>, %arg6: memref<8x1xf32, #tpu.memory_space<vmem>>) attributes {dimension_semantics = [#tpu.dimension_semantics<arbitrary>], iteration_bounds = array<i64: 2>, scalar_prefetch = 0 : i64, scratch_operands = 2 : i64, tpu.core_type = #tpu.core_type<tc>, window_params = [{transform_indices = @transform_0, window_bounds = array<i64: 8, 64>}, {transform_indices = @transform_1, window_bounds = array<i64: 8, 8>}, {pipeline_mode = #tpu.pipeline_mode<synchronous>, transform_indices = @transform_2, window_bounds = array<i64: 64, 32>}, {pipeline_mode = #tpu.pipeline_mode<synchronous>, transform_indices = @transform_3, window_bounds = array<i64: 8, 32>}]} {
    %c0_i32 = arith.constant 0 : i32
    %0 = arith.cmpi eq, %arg0, %c0_i32 : i32
    %1 = arith.extui %0 : i1 to i32
    %c0_i32_0 = arith.constant 0 : i32
    %2 = arith.cmpi ne, %1, %c0_i32_0 : i32
    scf.if %2 {
      %cst_18 = arith.constant 0.000000e+00 : f32
      %21 = vector.broadcast %cst_18 : f32 to vector<8x32xf32>
      %c0_19 = arith.constant 0 : index
      %c0_20 = arith.constant 0 : index
      %22 = vector.load %arg5[%c0_19, %c0_20] : memref<8x32xf32, #tpu.memory_space<vmem>>, vector<8x32xf32>
      tpu.vector_store %arg5[%c0_19, %c0_20], %21 {strides = array<i32>} : memref<8x32xf32, #tpu.memory_space<vmem>>, vector<8x32xf32>,
      %cst_21 = arith.constant 0.000000e+00 : f32
      %23 = vector.broadcast %cst_21 : f32 to vector<8x1xf32>
      %c0_22 = arith.constant 0 : index
      %c0_23 = arith.constant 0 : index
      %24 = vector.load %arg6[%c0_22, %c0_23] : memref<8x1xf32, #tpu.memory_space<vmem>>, vector<8x1xf32>
      tpu.vector_store %arg6[%c0_22, %c0_23], %23 {strides = array<i32>} : memref<8x1xf32, #tpu.memory_space<vmem>>, vector<8x1xf32>,
    } else {
    }
    %c0 = arith.constant 0 : index
    %c0_1 = arith.constant 0 : index
    %3 = vector.load %arg2[%c0, %c0_1] : memref<8x8xbf16, #tpu.memory_space<vmem>>, vector<8x8xbf16>
    %c0_2 = arith.constant 0 : index
    %c0_3 = arith.constant 0 : index
    %4 = vector.load %arg1[%c0_2, %c0_3] : memref<8x64xf32, #tpu.memory_space<vmem>>, vector<8x64xf32>
    %5 = arith.truncf %4 : vector<8x64xf32> to vector<8x64xbf16>
    %c0_4 = arith.constant 0 : index
    %c0_5 = arith.constant 0 : index
    %6 = vector.load %arg3[%c0_4, %c0_5] : memref<64x32xbf16, #tpu.memory_space<vmem>>, vector<64x32xbf16>
    %cst = arith.constant dense<0.000000e+00> : vector<8x32xf32>
    %7 = tpu.matmul %5, %6, %cst {dimension_numbers = #tpu.dot_dimension_numbers<[1], [0], [0], [1], [0, 0, 1, 1], [], []>} : vector<8x64xbf16>, vector<64x32xbf16>, vector<8x32xf32> -> vector<8x32xf32>
    %c0_6 = arith.constant 0 : index
    %c0_7 = arith.constant 0 : index
    %8 = vector.load %arg5[%c0_6, %c0_7] : memref<8x32xf32, #tpu.memory_space<vmem>>, vector<8x32xf32>
    %9 = arith.truncf %7 : vector<8x32xf32> to vector<8x32xbf16>
    %cst_8 = arith.constant dense<0.000000e+00> : vector<8x32xf32>
    %10 = tpu.matmul %3, %9, %cst_8 {dimension_numbers = #tpu.dot_dimension_numbers<[0], [0], [1], [1], [0, 1, 1, 1], [], []>} : vector<8x8xbf16>, vector<8x32xbf16>, vector<8x32xf32> -> vector<8x32xf32>
    %11 = arith.addf %8, %10 : vector<8x32xf32>
    %c0_9 = arith.constant 0 : index
    %c0_10 = arith.constant 0 : index
    %12 = vector.load %arg5[%c0_9, %c0_10] : memref<8x32xf32, #tpu.memory_space<vmem>>, vector<8x32xf32>
    tpu.vector_store %arg5[%c0_9, %c0_10], %11 {strides = array<i32>} : memref<8x32xf32, #tpu.memory_space<vmem>>, vector<8x32xf32>,
    %cst_11 = arith.constant 1.000000e+00 : bf16
    %13 = vector.broadcast %cst_11 : bf16 to vector<8x1xbf16>
    %c0_12 = arith.constant 0 : index
    %c0_13 = arith.constant 0 : index
    %14 = vector.load %arg6[%c0_12, %c0_13] : memref<8x1xf32, #tpu.memory_space<vmem>>, vector<8x1xf32>
    %cst_14 = arith.constant dense<0.000000e+00> : vector<8x1xf32>
    %15 = tpu.matmul %3, %13, %cst_14 {dimension_numbers = #tpu.dot_dimension_numbers<[0], [0], [1], [1], [0, 1, 1, 1], [], []>} : vector<8x8xbf16>, vector<8x1xbf16>, vector<8x1xf32> -> vector<8x1xf32>
    %16 = arith.addf %14, %15 : vector<8x1xf32>
    %c0_15 = arith.constant 0 : index
    %c0_16 = arith.constant 0 : index
    %17 = vector.load %arg6[%c0_15, %c0_16] : memref<8x1xf32, #tpu.memory_space<vmem>>, vector<8x1xf32>
    tpu.vector_store %arg6[%c0_15, %c0_16], %16 {strides = array<i32>} : memref<8x1xf32, #tpu.memory_space<vmem>>, vector<8x1xf32>,
    %c1_i32 = arith.constant 1 : i32
    %18 = arith.cmpi eq, %arg0, %c1_i32 : i32
    %19 = arith.extui %18 : i1 to i32
    %c0_i32_17 = arith.constant 0 : i32
    %20 = arith.cmpi ne, %19, %c0_i32_17 : i32
    scf.if %20 {
      %c0_18 = arith.constant 0 : index
      %c0_19 = arith.constant 0 : index
      %21 = vector.load %arg6[%c0_18, %c0_19] : memref<8x1xf32, #tpu.memory_space<vmem>>, vector<8x1xf32>
      %cst_20 = arith.constant 0.000000e+00 : f32
      %22 = vector.broadcast %cst_20 : f32 to vector<8x1xf32>
      %23 = arith.cmpf ogt, %21, %22 : vector<8x1xf32>
      %24 = tpu.reciprocal %21 {approx = true} : vector<8x1xf32> -> vector<8x1xf32>
      %cst_21 = arith.constant 0.000000e+00 : f32
      %25 = vector.broadcast %cst_21 : f32 to vector<8x1xf32>
      %26 = arith.select %23, %24, %25 : vector<8x1xi1>, vector<8x1xf32>
      %c0_22 = arith.constant 0 : index
      %c0_23 = arith.constant 0 : index
      %27 = vector.load %arg5[%c0_22, %c0_23] : memref<8x32xf32, #tpu.memory_space<vmem>>, vector<8x32xf32>
      %28 = vector.broadcast %26 : vector<8x1xf32> to vector<8x32xf32>
      %29 = arith.mulf %28, %27 : vector<8x32xf32>
      %30 = arith.truncf %29 : vector<8x32xf32> to vector<8x32xbf16>
      %c0_24 = arith.constant 0 : index
      %c0_25 = arith.constant 0 : index
      %31 = vector.load %arg4[%c0_24, %c0_25] : memref<8x32xbf16, #tpu.memory_space<vmem>>, vector<8x32xbf16>
      tpu.vector_store %arg4[%c0_24, %c0_25], %30 {strides = array<i32>} : memref<8x32xbf16, #tpu.memory_space<vmem>>, vector<8x32xbf16>,
    } else {
    }
    return
  }
  func.func @transform_0(%arg0: i32) -> (i32, i32) {
    %c0_i32 = arith.constant 0 : i32
    %c0_i32_0 = arith.constant 0 : i32
    return %arg0, %c0_i32 : i32, i32
  }
  func.func @transform_1(%arg0: i32) -> (i32, i32) {
    %c0_i32 = arith.constant 0 : i32
    %c0_i32_0 = arith.constant 0 : i32
    return %arg0, %c0_i32 : i32, i32
  }
  func.func @transform_2(%arg0: i32) -> (i32, i32) {
    %c0_i32 = arith.constant 0 : i32
    %c0_i32_0 = arith.constant 0 : i32
    %c0_i32_1 = arith.constant 0 : i32
    return %c0_i32, %c0_i32_0 : i32, i32
  }
  func.func @transform_3(%arg0: i32) -> (i32, i32) {
    %c0_i32 = arith.constant 0 : i32
    %c0_i32_0 = arith.constant 0 : i32
    %c0_i32_1 = arith.constant 0 : i32
    return %c0_i32, %c0_i32_0 : i32, i32
  }
}

</mosaic_0001>

<bundles_post_ra>
// kernel: tpu_custom_call.1
= control target key start
LH: loop header
LB: loop body
LE: loop exit
PB: predicated region body
PF: predicated region fallthrough
CT: control target
= control target key end

     0   :  { %8 = vsyncpa [#allocation5], 0  ;;  %s595_s12 = smov 0   ;;  %s656_s0 = inlined_call_operand.vmem [shape: f32[16,64], index: 0, kind: input, shape index: {}]   ;;  %s657_s1 = inlined_call_operand.vmem [shape: bf16[16,8], index: 1, kind: input, shape index: {}]   ;;  %s658_s2 = inlined_call_operand.vmem [shape: bf16[64,32], index: 2, kind: input, shape index: {}]   ;;  %s659_s3 = inlined_call_operand.hbm [shape: bf16[8,32], index: 3, kind: output, shape index: {}]  }
   0x1 LB: > { %s601_s13 = sadd.s32 4294967295, %s567_s12   ;;  %p455_p0 = scmp.ge.s32.totalorder %s567_s12, 1  ;;  %s567_s12 = sphi %s595_s12, %s14_s12  }
   0x2   : > { %p141_p1 = scmp.lt.s32.totalorder %s567_s12, 3 }
   0x4   : > { %p142_p2 = pnand %p455_p0, %p141_p1 }
   0x5   : > { %p163_p3 = scmp.lt.s32.totalorder (!%p142_p2), %s601_s13, 1  ;;  %p458_p4 = scmp.ne.s32.totalorder (!%p142_p2), %s601_s13, 0 }
   0x6   : > { %145 = sbr.rel (%p142_p2) target bundleno = 656 (0x290), region = 32 }
   0xd   : > { %s164_s14 = scalar_select %p163_p3, %s601_s13, 1 }
   0xe   : > { %176 = sbr.rel (%p458_p4) target bundleno = 21 (0x15), region = 36  ;;  %vm177_vm0 = vcmask (!%p458_p4), 261120   ;;  %vm179_vm1 = vcmask (!%p458_p4), 7168   ;;  %v569_v0 = vmov (!%p458_p4), 0.0  }
   0xf   : > { %s456_s15 = sshll.u32 %s164_s14, 3  ;;  %s457_s16 = sshll.u32 %s164_s14, 2  ;;  %178 = vst.msk [vmem:[#allocation2] sm:$0xff] (!%p458_p4), %vm177_vm0, %v569_v0 }
  0x10   : > { %s166_s19 = scalar_lea.vmem %s656_s0, %s456_s15  ;;  %s170_s22 = scalar_lea.vmem %s657_s1, %s457_s16  ;;  %180 = vst.msk [vmem:[#allocation3] sm:$0xff] (!%p458_p4), %vm179_vm1, %v569_v0 }
  0x15 PF: > { %v524_v1 = vld [vmem:[%s658_s2] sm:$0xff]   ;;  %v570_v2 = vmov 0.0   ;;  %v525_v3 = vld [vmem:[%s658_s2 + $0x8] sm:$0xff]   ;;  %vm571_vm2 = vmmov 0   ;;  %v526_v5 = vld [vmem:[%s658_s2 + $0x10] sm:$0xff]   ;;  %vm216_vm3 = vcmask 523264  }
  0x16   : > { %480 = vmatprep.subr.bf16.mxu0 %v570_v2  ;;  %492 = vmatprep.subr.bf16.mxu1 %v570_v2  ;;  %v181_v4 = vld [vmem:[%s170_s22] sm:$0xf]  ;;  %v527_v6 = vld [vmem:[%s658_s2 + $0x18] sm:$0xff]   ;;  %vm282_vm4 = vcmask 1043456   ;;  %vm278_vm5 = vcmask 64512   ;;  %v572_v16 = vmov 0  }
  0x17   : > { %481 = vmatpush3.bf16.msra.mxu0 %v524_v1  ;;  %488 = vmatprep.mubr.msk.bf16.mxu0 %vm571_vm2, %v570_v2  ;;  %v182_v7 = vld [vmem:[%s166_s19] sm:$0xff]  ;;  %v331_v17 = vsel %vm282_vm4, 1065369472, %v572_v16  ;;  %vm327_vm6 = vcmask 261120   ;;  %v329_v24 = vld [vmem:[#allocation3] sm:$0xff]  ;;  %vm374_vm7 = vcmask 7168  }
  0x18   : > { %482 = vmatprep.subr.bf16.mxu0 %v570_v2  ;;  %494 = vmatprep.mubr.msk.bf16.mxu1 %vm571_vm2, %v570_v2  ;;  %v183_v8 = vpack.c.bf16 %v182_v7, %v182_v7  ;;  %v260_v18 = vld [vmem:[#allocation2] sm:$0xff]  ;;  %p466_p5 = scmp.ne.s32.totalorder %s601_s13, 1 }
  0x19   : > { %262 = vxpose.xlu0.c.b16.start.end [1/1] (short) (narrow) %v181_v4, 16  ;;  %v573_v31 = vmov (!%p466_p5), 0   ;;  %vm392_vm9 = vcmask (!%p466_p5), 257024  }
  0x1b   : > { %483 = vmatpush3.bf16.msra.mxu0 %v525_v3 }
  0x1c   : > { %484 = vmatprep.subr.bf16.mxu0 %v570_v2 }
  0x1f   : > { %485 = vmatpush3.bf16.msra.mxu0 %v526_v5 }
  0x20   : > { %486 = vmatprep.subr.bf16.mxu0 %v570_v2 }
  0x22   : > { %528 = vset.pattern.permute.xlu0 (!%p466_p5), %v573_v31 }
  0x23   : > { %487 = vmatpush3.bf16.msra.mxu0 %v527_v6 }
  0x26   : > { %489 = vmatmul.mubr.msk.bf16.vlgmr.msra.gmra.mrb[0].mxu0 %vm216_vm3, %v183_v8 }
  0x7f   : > { %v270_v15 = vpop.trf.xlu0 }
  0xf9   : > { %v254_v9 = vpop.f32.mrb[0].mxu0 }
  0xfa   : > { %v261_v10 = vpack.c.bf16 %v254_v9, %v254_v9  ;;  %v490_v11 = vpop.f32.mrb[1].mxu0 }
  0xfb   : > { %v257_v12 = vpop.f32.mrb[2].mxu0 }
  0xfc   : > { %v491_v13 = vpop.f32.mrb[3].mxu0  ;;  %v284_v14 = vsel %vm282_vm4, %v261_v10, 0 }
  0xfd   : > { %493 = vmatpush3.bf16.msra.mxu1 %v284_v14 }
  0xfe   : > { %498 = vmatprep.subr.bf16.mxu1 %v570_v2 }
 0x100   : > { %495 = vmatmul.mubr.msk.bf16.vlgmr.msra.gmra.mrb[0].mxu1 %vm278_vm5, %v270_v15 }
 0x101   : > { %499 = vmatpush3.bf16.msra.mxu1 %v331_v17  ;;  %500 = vmatprep.mubr.msk.bf16.mxu1 %vm571_vm2, %v570_v2 }
 0x108   : > { %501 = vmatmul.mubr.msk.bf16.vlgmr.msra.gmra.mrb[4].mxu1 %vm278_vm5, %v270_v15 }
 0x1d3   : > { %v320_v19 = vpop.f32.mrb[0].mxu1 }
 0x1d4   : > { %v326_v20 = vadd.f32 %v320_v19, %v260_v18  ;;  %v496_v21 = vpop.f32.mrb[1].mxu1 }
 0x1d5   : > { %v323_v22 = vpop.f32.mrb[2].mxu1 }
 0x1d6   : > { %328 = vst.msk [vmem:[#allocation2] sm:$0xff] %vm327_vm6, %v326_v20  ;;  %v497_v23 = vpop.f32.mrb[3].mxu1 }
 0x1d8   : > { %379 = sbr.rel (%p466_p5) target bundleno = 631 (0x277), region = 40 }
 0x1db   : > { %v367_v25 = vpop.f32.mrb[4].mxu1 }
 0x1dc   : > { %v373_v26 = vadd.f32 %v367_v25, %v329_v24  ;;  %v502_v27 = vpop.f32.mrb[5].mxu1 }
 0x1dd   : > { %v370_v28 = vpop.f32.mrb[6].mxu1  ;;  %v384_v34 = vld [vmem:[#allocation2] sm:$0xff] (!%p466_p5) }
 0x1de   : > { %375 = vst.msk [vmem:[#allocation3] sm:$0xff] %vm374_vm7, %v373_v26  ;;  %v503_v29 = vpop.f32.mrb[7].mxu1 }
 0x1e5   : > { %v380_v30 = vld [vmem:[#allocation3] sm:$0xff] }
 0x1e6   : > { %529 = vrcp.f32 %v380_v30  ;;  %vm381_vm8 = vcmp.gt.f32.partialorder %v380_v30, 0.0 }
 0x1f0   : > { %v530_v32 = vpop.eup %529 }
 0x1f1   : > { %v383_v33 = vsel %vm381_vm8, %v530_v32, 0.0 }
 0x1f2   : > { %387 = vperm.xlu0 %528, %v383_v33  }
 0x271   : > { %v388_v35 = vpop.permute.xlu0 %387 }
 0x272   : > { %v390_v36 = vmul.f32 %v388_v35, %v384_v34 }
 0x274   : > { %v391_v37 = vpack.c.bf16 %v390_v36, %v390_v36 }
 0x276   : > { %393 = vst.msk [vmem:[#allocation4] sm:$0xf] %vm392_vm9, %v391_v37 }
 0x277 PF: > { %p508_p6 = scmp.eq.s32.totalorder %s601_s13, 1  ;;  %s574_s4 = smov [#allocation4]  }
 0x278   : > { %s401_s5 = sshll.u32 %s574_s4, 4  ;;  %s402_s5 = int_to_ptr.vmem [resolvable:$true] %s401_s5 }
 0x279   : > { %s531_s6 = scalar_lea.vmem %s402_s5, 64  ;;  %p538_p10 = scmp.lt.s32.totalorder %s402_s5, %s402_s5 }
 0x27a   : > { %p532_p7 = scmp.ne.s32.totalorder %s402_s5, %s531_s6  ;;  %p539_p11 = scmp.lt.s32.totalorder %s531_s6, %s531_s6 }
 0x27c   : > { %p533_p8 = pnand %p532_p7, %p508_p6  ;;  %p540_p12 = por %p539_p11, %p538_p10 }
 0x27e   : > { %p534_p9 = pneg %p533_p8 }
 0x280   : > { %p541_p13 = pnand %p540_p12, %p534_p9 }
 0x282   : > { %544 = shalt.err (!%p541_p13)
}
 0x283   : > { %s545_s9 = scalar_lea.hbm %s659_s3, 64 }
 0x284   : > { %p546_p0 = scmp.ne.s32.totalorder %s659_s3, %s545_s9  ;;  %p551_p3 = scmp.lt.u32.totalorder %s545_s9, %s659_s3 }
 0x286   : > { %p547_p1 = pnand %p546_p0, %p508_p6 }
 0x288   : > { %p548_p2 = pneg %p547_p1 }
 0x28a   : > { %p553_p4 = pnand %p551_p3, %p548_p2 }
 0x28c   : > { %556 = shalt.err (!%p553_p4)
}
 0x28d   : > { %505 = dma.vmem_to_hbm [thread:$0]  (%p508_p6), %s402_s5, 64, %s659_s3, [#allocation5]  }
 0x28e   : > { %562 = dma.done.wait (%p508_p6), [#allocation5], 64  }
 0x28f   : > { %564 = vsyncadd (%p508_p6), [#allocation5], 4294967232 }
 0x290 PF: > { %s14_s12 = sadd.s32 1, %s567_s12  }
 0x291   : > { %p11_p5 = scmp.ge.s32.totalorder %s14_s12, 4  }
 0x293   :  { %13 = sbr.rel (!%p11_p5) target bundleno = 1 (0x1), region = 70 }
 0x29a   :  { %414 = vsyncpa [#allocation5], 1 }
 0x29b   :  { %416 = vsyncpa [#allocation5 + $0x1], 1 }

</bundles_post_ra>
